<compile_context>
chip_gen: v5e
topology: v5e:2x2
jax: 0.10.0
libtpu: 0.0.40
codegen_flags: <defaults>
</compile_context>

<pallas_src>
import jax
import jax.numpy as jnp
from jax.experimental import pallas as pl
from jax.experimental.pallas import tpu as pltpu


def _round_up(x, m):
    return ((x + m - 1) // m) * m


def _row_tiling(n, tm_max=512, mult=16):
    """Return (padded_rows, tile_rows, num_tiles) with tile_rows * num_tiles
    == padded_rows, tile_rows a multiple of `mult` (bf16 sublane packing),
    and num_tiles >= 2 so the "parallel" row axis can shard across v7x's two
    TensorCores (free on single-TC v5e/v6e)."""
    t = max(2, pl.cdiv(n, tm_max))
    tm = _round_up(pl.cdiv(n, t), mult)
    return tm * t, tm, t


# ----------------------------- Pallas kernels ------------------------------

def _mlp_l2norm_kernel(x_ref, w1_ref, b1_ref, w2_ref, b2_ref, o_ref):
    # x: (TM, Cin_p) bf16 | w1: (Cin_p, NC_p) bf16 | b1: (1, NC_p) f32
    # w2: (NC_p, NC_p) bf16 | b2: (1, NC_p) f32    | o: (TM, NC_p) f32
    h = jnp.dot(x_ref[...], w1_ref[...],
                preferred_element_type=jnp.float32) + b1_ref[...]
    h = jnp.maximum(h, 0.0)                                        # ReLU
    y = jnp.dot(h.astype(jnp.bfloat16), w2_ref[...],
                preferred_element_type=jnp.float32) + b2_ref[...]
    # Normalize(power=2): out = y / (||y||_2 + 1e-7).  Padded channels are
    # exactly zero so the sum over NC_p equals the sum over the real nc.
    # rsqrt runs on the EUP slot (idle here); eps keeps zero-padded rows at 0.
    sumsq = jnp.sum(y * y, axis=-1, keepdims=True)
    o_ref[...] = (y * jax.lax.rsqrt(sumsq + 1e-14)).astype(o_ref.dtype)


def _l2norm_kernel(x_ref, o_ref):
    x = x_ref[...].astype(jnp.float32)
    sumsq = jnp.sum(x * x, axis=-1, keepdims=True)
    o_ref[...] = (x * jax.lax.rsqrt(sumsq + 1e-14)).astype(o_ref.dtype)


# ----------------------------- Kernel wrappers ------------------------------

def grouped_mlp_l2norm(xs, w1, b1, w2, b2, nc, tm_max=512):
    """Fused Linear->ReLU->Linear->L2norm for ALL feature levels in one call.

    xs : list of (n_l, C_l) f32 arrays (one per level).
    w1 : (L, Cin_p, NC_p) bf16 stacked, zero-padded weights (x @ W^T layout).
    b1 : (L, 1, NC_p) f32.   w2 : (L, NC_p, NC_p) bf16.   b2 : (L, 1, NC_p) f32.
    Returns a list of (n_l, nc) f32 arrays.
    """
    L, cin_p, nc_p = w1.shape
    n_max = max(x.shape[0] for x in xs)
    n_pad, tm, n_tiles = _row_tiling(n_max, tm_max)
    # Stack the per-level row blocks once: (L, n_pad, Cin_p) bf16 (cast + pad
    # + stack fuse into one producer fusion; zero padding is exact).
    xp = jnp.stack([
        jnp.pad(x.astype(jnp.bfloat16),
                ((0, n_pad - x.shape[0]), (0, cin_p - x.shape[1])))
        for x in xs])

    out = pl.pallas_call(
        _mlp_l2norm_kernel,
        out_shape=jax.ShapeDtypeStruct((L, n_pad, nc_p), jnp.float32),
        grid=(L, n_tiles),                  # row tiles innermost: weights are
        in_specs=[                          # re-fetched only on level change.
            pl.BlockSpec((None, tm, cin_p), lambda l, t: (l, t, 0)),
            pl.BlockSpec((None, cin_p, nc_p), lambda l, t: (l, 0, 0)),
            pl.BlockSpec((None, 1, nc_p), lambda l, t: (l, 0, 0)),
            pl.BlockSpec((None, nc_p, nc_p), lambda l, t: (l, 0, 0)),
            pl.BlockSpec((None, 1, nc_p), lambda l, t: (l, 0, 0)),
        ],
        out_specs=pl.BlockSpec((None, tm, nc_p), lambda l, t: (l, t, 0)),
        compiler_params=pltpu.CompilerParams(
            dimension_semantics=("parallel", "parallel")),
    )(xp, w1, b1, w2, b2)

    outs = []
    for l, x in enumerate(xs):
        o = out[l]
        if x.shape[0] != n_pad:
            o = o[: x.shape[0]]
        if nc != nc_p:                       # skip slice when nothing padded
            o = o[:, :nc]
        outs.append(o)
    return outs


def grouped_l2norm(xs, tm_max=1024):
    """L2 normalization over the channel (last) dim for ALL levels in one call."""
    c_p = _round_up(max(x.shape[1] for x in xs), 128)
    n_max = max(x.shape[0] for x in xs)
    n_pad, tm, n_tiles = _row_tiling(n_max, tm_max)
    # Concatenate the per-level row blocks (common padded channel width);
    # zero-padded channels/rows never change the real rows' norms.
    xp = jnp.concatenate([
        jnp.pad(x.astype(jnp.float32),
                ((0, n_pad - x.shape[0]), (0, c_p - x.shape[1])))
        for x in xs], axis=0)                          # (L * n_pad, c_p)
    L = len(xs)

    out = pl.pallas_call(
        _l2norm_kernel,
        out_shape=jax.ShapeDtypeStruct((L * n_pad, c_p), jnp.float32),
        grid=(L * n_tiles,),
        in_specs=[pl.BlockSpec((tm, c_p), lambda i: (i, 0))],
        out_specs=pl.BlockSpec((tm, c_p), lambda i: (i, 0)),
        compiler_params=pltpu.CompilerParams(
            dimension_semantics=("parallel",)),
    )(xp)

    outs = []
    for l, x in enumerate(xs):
        o = out[l * n_pad: l * n_pad + x.shape[0]]
        if x.shape[1] != c_p:
            o = o[:, : x.shape[1]]
        outs.append(o)
    return outs


# ----------------------------- Module wrapper ------------------------------

class PatchSampleF:
    """JAX/Pallas port of the PyTorch PatchSampleF module."""

    def __init__(self, use_mlp=False, init_gain=0.02, nc=256, seed=1234):
        self.use_mlp = use_mlp
        self.nc = nc
        self.init_gain = init_gain
        self.seed = seed
        self.mlp_init = False

    def create_mlp(self, feats):
        # Deterministic 'normal' init: weight ~ N(0, init_gain), bias = 0.
        key = jax.random.PRNGKey(self.seed)
        nc_p = _round_up(self.nc, 128)
        cins = [int(f.shape[1]) for f in feats]
        cin_p = _round_up(max(cins), 128)     # common padded input width so
        w1s, w2s = [], []                     # all levels share one kernel.
        for input_nc in cins:
            key, k1, k2 = jax.random.split(key, 3)
            # torch.nn.Linear stores weight as (out, in); store the transpose
            # so the kernel computes x @ W^T.
            W1 = (jax.random.normal(k1, (self.nc, input_nc), jnp.float32)
                  * self.init_gain).T
            W2 = (jax.random.normal(k2, (self.nc, self.nc), jnp.float32)
                  * self.init_gain).T
            # Pad once to lane-dense shapes; cast to bf16 once (MXU path).
            w1s.append(jnp.pad(W1, ((0, cin_p - input_nc),
                                    (0, nc_p - self.nc))).astype(jnp.bfloat16))
            w2s.append(jnp.pad(W2, ((0, nc_p - self.nc),
                                    (0, nc_p - self.nc))).astype(jnp.bfloat16))
        self.w1 = jnp.stack(w1s)                          # (L, cin_p, nc_p)
        self.w2 = jnp.stack(w2s)                          # (L, nc_p, nc_p)
        self.b1 = jnp.zeros((len(feats), 1, nc_p), jnp.float32)
        self.b2 = jnp.zeros((len(feats), 1, nc_p), jnp.float32)
        self.mlp_init = True

    def __call__(self, feats, num_patches=64, patch_ids=None, key=None):
        return_ids = []
        x_samples = []
        if self.use_mlp and not self.mlp_init:
            self.create_mlp(feats)
        if key is None:
            key = jax.random.PRNGKey(0)
        for feat_id, feat in enumerate(feats):
            B, C, H, W = feat.shape
            if num_patches > 0:
                if patch_ids is not None:
                    patch_id = patch_ids[feat_id]
                else:
                    key, sub = jax.random.split(key)
                    patch_id = jax.random.permutation(sub, H * W)
                    patch_id = patch_id[: int(min(num_patches, H * W))]
                # Gather-before-transpose: only the sampled columns leave the
                # NCHW map (B*C*P elements); the transpose runs on the tiny
                # (B, C, P) result.  If this minor-dim gather ever lowers to a
                # full-map pass, switch the producer to NHWC and fuse the row
                # gather into the kernel (scalar-prefetched ids + pl.Element).
                sampled = jnp.take(feat.reshape(B, C, H * W), patch_id, axis=2)
                x_sample = jnp.transpose(sampled, (0, 2, 1)).reshape(
                    B * patch_id.shape[0], C)
            else:
                # TODO(synk): num_patches == 0 branch (PyTorch normalizes the
                # full (B, HW, C) map over dim 1 and reshapes back to NCHW)
                # not implemented.
                raise NotImplementedError("num_patches == 0 path not implemented")
            return_ids.append(patch_id)
            x_samples.append(x_sample)

        # Single grouped pallas_call across ALL feature levels (one launch).
        if self.use_mlp:
            return_feats = grouped_mlp_l2norm(
                x_samples, self.w1, self.b1, self.w2, self.b2, nc=self.nc)
        else:
            return_feats = grouped_l2norm(x_samples)
        return return_feats, return_ids


# ----------------------------- Reference check -----------------------------

def _ref_forward(sampler, feats, patch_ids):
    """Pure-JAX reference (same weights, same patch ids, same bf16 MXU math,
    original PyTorch eps semantics x / (||x|| + 1e-7))."""
    outs = []
    for l, feat in enumerate(feats):
        B, C, H, W = feat.shape
        pid = patch_ids[l]
        fr = jnp.transpose(feat, (0, 2, 3, 1)).reshape(B, H * W, C)
        x = fr[:, pid, :].reshape(B * pid.shape[0], C)
        if sampler.use_mlp:
            nc = sampler.nc
            w1 = sampler.w1[l][:C, :nc]
            w2 = sampler.w2[l][:nc, :nc]
            b1 = sampler.b1[l][:, :nc]
            b2 = sampler.b2[l][:, :nc]
            h = jnp.dot(x.astype(jnp.bfloat16), w1,
                        preferred_element_type=jnp.float32) + b1
            h = jnp.maximum(h, 0.0)
            x = jnp.dot(h.astype(jnp.bfloat16), w2,
                        preferred_element_type=jnp.float32) + b2
        xf = x.astype(jnp.float32)
        norm = jnp.sqrt(jnp.sum(xf * xf, axis=1, keepdims=True))
        outs.append(xf / (norm + 1e-7))
    return outs


if __name__ == "__main__":
    key = jax.random.PRNGKey(0)
    k0, k1, ksample = jax.random.split(key, 3)

    # Small shapes consistent with the module (NCHW feature maps).
    feats = [
        jax.random.normal(k0, (2, 4, 16, 16), jnp.float32),
        jax.random.normal(k1, (2, 8, 8, 8), jnp.float32),
    ]
    num_patches = 8

    # MLP path — single grouped Linear->ReLU->Linear->L2norm Pallas kernel.
    sampler = PatchSampleF(use_mlp=True, init_gain=0.02, nc=32, seed=1234)
    out_feats, out_ids = sampler(feats, num_patches=num_patches, key=ksample)
    for o in out_feats:
        jax.block_until_ready(o)

    ref_feats = _ref_forward(sampler, feats, out_ids)
    for got, ref in zip(out_feats, ref_feats):
        assert got.shape == ref.shape
        assert got.dtype == jnp.float32
        assert jnp.allclose(got, ref, atol=2e-3, rtol=2e-3)

    # No-MLP path — single grouped L2-norm-only Pallas kernel (pure f32).
    sampler_plain = PatchSampleF(use_mlp=False)
    out_feats2, out_ids2 = sampler_plain(feats, num_patches=num_patches,
                                         key=ksample)
    for o in out_feats2:
        jax.block_until_ready(o)

    ref_feats2 = _ref_forward(sampler_plain, feats, out_ids2)
    for got, ref in zip(out_feats2, ref_feats2):
        assert got.shape == ref.shape
        assert got.dtype == jnp.float32
        assert jnp.allclose(got, ref, atol=1e-4, rtol=1e-4)

    print("KERNEL_OK")
</pallas_src>

<mosaic_0001>
module attributes {stable_mosaic.version = 11 : i64} {
  func.func @_mlp_l2norm_kernel(%arg0: i32, %arg1: i32, %arg2: memref<1x16x128xbf16, #tpu.memory_space<vmem>>, %arg3: memref<1x128x128xbf16, #tpu.memory_space<vmem>>, %arg4: memref<1x1x128xf32, #tpu.memory_space<vmem>>, %arg5: memref<1x128x128xbf16, #tpu.memory_space<vmem>>, %arg6: memref<1x1x128xf32, #tpu.memory_space<vmem>>, %arg7: memref<1x16x128xf32, #tpu.memory_space<vmem>>) attributes {dimension_semantics = [#tpu.dimension_semantics<parallel>, #tpu.dimension_semantics<parallel>], iteration_bounds = array<i64: 2, 2>, scalar_prefetch = 0 : i64, scratch_operands = 0 : i64, tpu.core_type = #tpu.core_type<tc>, window_params = [{transform_indices = @transform_0, window_bounds = array<i64: 1, 16, 128>}, {transform_indices = @transform_1, window_bounds = array<i64: 1, 128, 128>}, {transform_indices = @transform_2, window_bounds = array<i64: 1, 1, 128>}, {transform_indices = @transform_3, window_bounds = array<i64: 1, 128, 128>}, {transform_indices = @transform_4, window_bounds = array<i64: 1, 1, 128>}, {transform_indices = @transform_5, window_bounds = array<i64: 1, 16, 128>}]} {
    %c0 = arith.constant 0 : index
    %c0_0 = arith.constant 0 : index
    %c0_1 = arith.constant 0 : index
    %0 = vector.load %arg2[%c0, %c0_0, %c0_1] : memref<1x16x128xbf16, #tpu.memory_space<vmem>>, vector<1x16x128xbf16>
    %1 = vector.shape_cast %0 : vector<1x16x128xbf16> to vector<16x128xbf16>
    %c0_2 = arith.constant 0 : index
    %c0_3 = arith.constant 0 : index
    %c0_4 = arith.constant 0 : index
    %2 = vector.load %arg3[%c0_2, %c0_3, %c0_4] : memref<1x128x128xbf16, #tpu.memory_space<vmem>>, vector<1x128x128xbf16>
    %3 = vector.shape_cast %2 : vector<1x128x128xbf16> to vector<128x128xbf16>
    %cst = arith.constant dense<0.000000e+00> : vector<16x128xf32>
    %4 = tpu.matmul %1, %3, %cst {dimension_numbers = #tpu.dot_dimension_numbers<[1], [0], [0], [1], [0, 0, 1, 1], [], []>} : vector<16x128xbf16>, vector<128x128xbf16>, vector<16x128xf32> -> vector<16x128xf32>
    %c0_5 = arith.constant 0 : index
    %c0_6 = arith.constant 0 : index
    %c0_7 = arith.constant 0 : index
    %5 = vector.load %arg4[%c0_5, %c0_6, %c0_7] : memref<1x1x128xf32, #tpu.memory_space<vmem>>, vector<1x1x128xf32>
    %6 = vector.shape_cast %5 : vector<1x1x128xf32> to vector<1x128xf32>
    %7 = vector.broadcast %6 : vector<1x128xf32> to vector<16x128xf32>
    %8 = arith.addf %4, %7 : vector<16x128xf32>
    %cst_8 = arith.constant 0.000000e+00 : f32
    %9 = vector.broadcast %cst_8 : f32 to vector<16x128xf32>
    %10 = arith.maximumf %8, %9 : vector<16x128xf32>
    %11 = arith.truncf %10 : vector<16x128xf32> to vector<16x128xbf16>
    %c0_9 = arith.constant 0 : index
    %c0_10 = arith.constant 0 : index
    %c0_11 = arith.constant 0 : index
    %12 = vector.load %arg5[%c0_9, %c0_10, %c0_11] : memref<1x128x128xbf16, #tpu.memory_space<vmem>>, vector<1x128x128xbf16>
    %13 = vector.shape_cast %12 : vector<1x128x128xbf16> to vector<128x128xbf16>
    %cst_12 = arith.constant dense<0.000000e+00> : vector<16x128xf32>
    %14 = tpu.matmul %11, %13, %cst_12 {dimension_numbers = #tpu.dot_dimension_numbers<[1], [0], [0], [1], [0, 0, 1, 1], [], []>} : vector<16x128xbf16>, vector<128x128xbf16>, vector<16x128xf32> -> vector<16x128xf32>
    %c0_13 = arith.constant 0 : index
    %c0_14 = arith.constant 0 : index
    %c0_15 = arith.constant 0 : index
    %15 = vector.load %arg6[%c0_13, %c0_14, %c0_15] : memref<1x1x128xf32, #tpu.memory_space<vmem>>, vector<1x1x128xf32>
    %16 = vector.shape_cast %15 : vector<1x1x128xf32> to vector<1x128xf32>
    %17 = vector.broadcast %16 : vector<1x128xf32> to vector<16x128xf32>
    %18 = arith.addf %14, %17 : vector<16x128xf32>
    %19 = arith.mulf %18, %18 : vector<16x128xf32>
    %cst_16 = arith.constant dense<0.000000e+00> : vector<16xf32>
    %20 = vector.multi_reduction <add>, %19, %cst_16 [1] : vector<16x128xf32> to vector<16xf32>
    %21 = vector.shape_cast %20 : vector<16xf32> to vector<16x1xf32>
    %cst_17 = arith.constant 9.99999982E-15 : f32
    %22 = vector.broadcast %cst_17 : f32 to vector<16x1xf32>
    %23 = arith.addf %21, %22 : vector<16x1xf32>
    %24 = math.rsqrt %23 : vector<16x1xf32>
    %25 = vector.broadcast %24 : vector<16x1xf32> to vector<16x128xf32>
    %26 = arith.mulf %18, %25 : vector<16x128xf32>
    %c0_18 = arith.constant 0 : index
    %c0_19 = arith.constant 0 : index
    %c0_20 = arith.constant 0 : index
    %27 = vector.load %arg7[%c0_18, %c0_19, %c0_20] : memref<1x16x128xf32, #tpu.memory_space<vmem>>, vector<1x16x128xf32>
    %28 = vector.shape_cast %27 : vector<1x16x128xf32> to vector<16x128xf32>
    %29 = vector.shape_cast %26 : vector<16x128xf32> to vector<1x16x128xf32>
    tpu.vector_store %arg7[%c0_18, %c0_19, %c0_20], %29 {strides = array<i32>} : memref<1x16x128xf32, #tpu.memory_space<vmem>>, vector<1x16x128xf32>,
    return
  }
  func.func @transform_0(%arg0: i32, %arg1: i32) -> (i32, i32, i32) {
    %c0_i32 = arith.constant 0 : i32
    %c0_i32_0 = arith.constant 0 : i32
    return %arg0, %arg1, %c0_i32 : i32, i32, i32
  }
  func.func @transform_1(%arg0: i32, %arg1: i32) -> (i32, i32, i32) {
    %c0_i32 = arith.constant 0 : i32
    %c0_i32_0 = arith.constant 0 : i32
    %c0_i32_1 = arith.constant 0 : i32
    return %arg0, %c0_i32, %c0_i32_0 : i32, i32, i32
  }
  func.func @transform_2(%arg0: i32, %arg1: i32) -> (i32, i32, i32) {
    %c0_i32 = arith.constant 0 : i32
    %c0_i32_0 = arith.constant 0 : i32
    %c0_i32_1 = arith.constant 0 : i32
    return %arg0, %c0_i32, %c0_i32_0 : i32, i32, i32
  }
  func.func @transform_3(%arg0: i32, %arg1: i32) -> (i32, i32, i32) {
    %c0_i32 = arith.constant 0 : i32
    %c0_i32_0 = arith.constant 0 : i32
    %c0_i32_1 = arith.constant 0 : i32
    return %arg0, %c0_i32, %c0_i32_0 : i32, i32, i32
  }
  func.func @transform_4(%arg0: i32, %arg1: i32) -> (i32, i32, i32) {
    %c0_i32 = arith.constant 0 : i32
    %c0_i32_0 = arith.constant 0 : i32
    %c0_i32_1 = arith.constant 0 : i32
    return %arg0, %c0_i32, %c0_i32_0 : i32, i32, i32
  }
  func.func @transform_5(%arg0: i32, %arg1: i32) -> (i32, i32, i32) {
    %c0_i32 = arith.constant 0 : i32
    %c0_i32_0 = arith.constant 0 : i32
    return %arg0, %arg1, %c0_i32 : i32, i32, i32
  }
}

</mosaic_0001>

<bundles_post_ra>
// kernel: tpu_custom_call.1
= control target key start
LH: loop header
LB: loop body
LE: loop exit
PB: predicated region body
PF: predicated region fallthrough
CT: control target
= control target key end

     0   :  { %s1604_s0 = inlined_call_operand.hbm [shape: bf16[2,32,128], index: 0, kind: input, shape index: {}]   ;;  %s1605_s1 = inlined_call_operand.hbm [shape: bf16[2,128,128], index: 1, kind: input, shape index: {}]   ;;  %s1606_s2 = inlined_call_operand.hbm [shape: f32[2,1,128], index: 2, kind: input, shape index: {}]   ;;  %s1607_s3 = inlined_call_operand.hbm [shape: bf16[2,128,128], index: 3, kind: input, shape index: {}]   ;;  %s1608_s4 = inlined_call_operand.vmem [shape: f32[2,1,128], index: 4, kind: input, shape index: {}]   ;;  %s1609_s5 = inlined_call_operand.hbm [shape: f32[2,32,128], index: 5, kind: output, shape index: {}]  }
   0x1   :  { %1628 = sst [smem:[#allocation26_spill]] %s1604_s0 }
   0x2   :  { %1629 = sst [smem:[#allocation27_spill]] %s1605_s1 }
   0x3   :  { %1630 = sst [smem:[#allocation28_spill]] %s1606_s2 }
   0x4   :  { %1631 = sst [smem:[#allocation29_spill]] %s1608_s4 }
   0x5   :  { %1632 = sst [smem:[#allocation30_spill]] %s1609_s5 }
   0x6   :  { %10 = vsyncpa [#allocation3], 0 }
   0x7   :  { %12 = vsyncpa [#allocation3 + $0x1], 0 }
   0x8   :  { %13 = vsyncpa [#allocation6], 0 }
   0x9   :  { %15 = vsyncpa [#allocation6 + $0x1], 0 }
   0xa   :  { %16 = vsyncpa [#allocation9], 0 }
   0xb   :  { %18 = vsyncpa [#allocation9 + $0x1], 0 }
   0xc   :  { %19 = vsyncpa [#allocation4], 0 }
   0xd   :  { %21 = vsyncpa [#allocation4 + $0x1], 0  ;;  %s1306_s18 = smov 0   ;;  %s1308_s19 = smov 0  }
   0xe   :  { %s1310_s20 = smov 0   ;;  %s1312_s21 = smov 0  }
   0xf   :  { %s1314_s22 = smov 0   ;;  %s1316_s23 = smov 0  }
  0x10   :  { %s1318_s24 = smov 0   ;;  %s1320_s25 = smov 0  }
  0x11   :  { %s1322_s26 = smov 0   ;;  %s1324_s27 = smov 0  }
  0x12   :  { %s1326_s28 = smov 0  }
  0x13 LB: > { %1633 = sst [smem:[#allocation15_spill]] %s1238_s20  ;;  %p56_p0 = scmp.eq.s32.totalorder %s1270_s28, 0  ;;  %s1270_s28 = sphi %s1326_s28, %s27_s28   ;;  %s1266_s27 = sphi %s1324_s27, %s1679_s27   ;;  %s1262_s26 = sphi %s1322_s26, %s1678_s26   ;;  %s1258_s25 = sphi %s1320_s25, %s1677_s25   ;;  %s1254_s24 = sphi %s1318_s24, %s1670_s24   ;;  %s1250_s23 = sphi %s1316_s23, %s1669_s23   ;;  %s1246_s22 = sphi %s1314_s22, %s1676_s22   ;;  %s1242_s21 = sphi %s1312_s21, %s1675_s21   ;;  %s1238_s20 = sphi %s1310_s20, %s1667_s20   ;;  %s1234_s19 = sphi %s1308_s19, %s1674_s19   ;;  %s1230_s18 = sphi %s1306_s18, %s1673_s18  }
  0x14   : > { %1634 = sst [smem:[#allocation16_spill]] %s1250_s23  ;;  %p81_p1 = scmp.ne.s32.totalorder %s1238_s20, %s1234_s19 }
  0x15   : > { %1635 = sst [smem:[#allocation17_spill]] %s1254_s24  ;;  %p87_p2 = scmp.ne.s32.totalorder %s1234_s19, %s1230_s18 }
  0x16   : > { %1636 = sst [smem:[#allocation18_spill]] %s1258_s25  ;;  %p1617_p3 = scmp.lt.s32.totalorder %s1270_s28, 4 }
  0x17   : > { %1637 = sst [smem:[#allocation19_spill]] %s1262_s26  ;;  %p83_p4 = por %p81_p1, %p56_p0 }
  0x18   : > { %s241_s30 = sand.u32 1, %s1270_s28   ;;  %s1372_s6 = sand.u32 1, %s1238_s20  }
  0x19   : > { %s1610_s7 = sshll.u32 %s1372_s6, 6  ;;  %s1611_s8 = sshll.u32 %s1266_s27, 6 }
  0x1a   : > { %s1638_s1 = sld [smem:[#allocation27_spill]]  ;;  %s245_s13 = scalar_lea.vmem [#allocation5], %s1610_s7 }
  0x1b   : > { %s253_s14 = sshll.u32 %s245_s13, 4  ;;  %p1385_p5 = pnand %p1617_p3, %p83_p4  ;;  %s254_s14 = int_to_ptr.vmem [resolvable:$true] %s253_s14 }
  0x1c   : > { %p795_p6 = scmp.ge.s32.totalorder %s1270_s28, 1  ;;  %p306_p7 = scmp.lt.s32.totalorder %s1270_s28, 5 }
  0x1d   : > { %s1391_s16 = scalar_lea.sflag [#allocation6], %s241_s30  ;;  %s1612_s17 = smov 64  }
  0x1e   : > { %s1614_s9 = smov 4   ;;  %p1399_p8 = pnand %p795_p6, %p306_p7 }
  0x1f   : > { %s782_s30 = sadd.s32 4294967294, %s1270_s28   ;;  %s36_s13 = sadd.s32 1, %s1262_s26 }
  0x20   : > { %s250_s11 = scalar_lea.hbm %s1638_s1, %s1611_s8  ;;  %p37_p9 = scmp.ge.s32.totalorder %s36_s13, 2 }
  0x21   : > { %s251_s12 = sshll.u32 %s250_s11, 4  ;;  %s1404_s11 = sadd.s32 4294967295, %s1270_s28   ;;  %s252_s12 = int_to_ptr.hbm [resolvable:$true] %s251_s12 }
  0x22   : > { %909 = dma.hbm_to_vmem [thread:$0]  (!%p1385_p5), %s252_s12, 1024, %s254_s14, %s1391_s16, %s1612_s17, %s1612_s17, %s1614_s9  }
  0x23   : > { %s39_s7 = sadd.s32 1, %s1266_s27  ;;  %s48_s12 = sadd.s32 1, %s1250_s23 }
  0x24   : > { %p55_p10 = scmp.ne.s32.totalorder %s1250_s23, %s1246_s22  ;;  %s1681_s13 = smov (%p37_p9, %s36_s13), 0 }
  0x25   : > { %1641 = sst [smem:[#allocation20_spill]] %s1681_s13  ;;  %s1683_s7 = smov (!%p37_p9, %s39_s7), %s1266_s27 }
  0x26   : > { %s44_s14 = ssub.s32 %s1262_s26, %s1681_s13  ;;  %p1422_p11 = por %p56_p0, %p55_p10 }
  0x27   : > { %p41_p12 = scmp.ge.s32.totalorder %s1683_s7, 2  ;;  %p61_p13 = scmp.ne.s32.totalorder %s1246_s22, %s1242_s21 }
  0x28   : > { %p62_p1 = scmp.eq.s32.totalorder %s1404_s11, 0  ;;  %p191_p4 = scmp.eq.s32.totalorder %s1404_s11, 3 }
  0x29   : > { %s1685_s7 = smov (%p41_p12, %s1683_s7), 0  ;;  %p197_p3 = scmp.eq.s32.totalorder %s782_s30, 3 }
  0x2a   : > { %1643 = sst [smem:[#allocation21_spill]] %s1685_s7  ;;  %p1435_p6 = por %p62_p1, %p61_p13 }
  0x2b   : > { %p1442_p0 = por %p87_p2, %p62_p1  ;;  %s43_s29 = ssub.s32 %s1266_s27, %s1685_s7 }
  0x2c   : > { %p1451_p7 = por %p191_p4, %p55_p10  ;;  %s45_s13 = sor.u32 %s44_s14, %s43_s29 }
  0x2d   : > { %s1645_s9 = scalar_select %p1442_p0, 1, 0 }
  0x2e   : > { %s1647_s1 = scalar_select %p1451_p7, 1, 0 }
  0x2f   : > { %1646 = sst [smem:[#allocation22_spill]] %s1645_s9  ;;  %p72_p9 = scmp.eq.s32.totalorder %s43_s29, 0 }
  0x30   : > { %1648 = sst [smem:[#allocation23_spill]] %s1647_s1  ;;  %p46_p12 = scmp.eq.s32.totalorder %s45_s13, 0 }
  0x31   : > { %s1649_s5 = sadd.s32 1, %s1238_s20  ;;  %p1466_p2 = por %p197_p3, %p61_p13 }
  0x32   : > { %s1458_s24 = scalar_select %p72_p9, %s1238_s20, %s1649_s5  }
  0x33   : > { %s1461_s18 = scalar_select %p46_p12, %s1250_s23, %s48_s12  }
  0x34   : > { %1650 = sst [smem:[#allocation24_spill]] %s1458_s24  ;;  %s217_s4 = sand.u32 1, %s1250_s23  }
  0x35   : > { %1651 = sst [smem:[#allocation25_spill]] %s1461_s18  ;;  %s785_s25 = sshll.u32 %s217_s4, 3 }
  0x36   : > { %s786_s14 = sshll.u32 %s1262_s26, 1  ;;  %s787_s1 = sshll.u32 %s1266_s27, 2 }
  0x37   : > { %s221_s9 = scalar_lea.vmem [#allocation2], %s785_s25  ;;  %s226_s30 = sadd.s32 %s787_s1, %s786_s14 }
  0x38   : > { %s231_s29 = sshll.u32 %s221_s9, 4  ;;  %s788_s5 = sshll.u32 %s226_s30, 2  ;;  %s232_s29 = int_to_ptr.vmem [resolvable:$true] %s231_s29 }
  0x39   : > { %p1653_p10 = scmp.lt.s32.totalorder %s1270_s28, 4  ;;  %s1654_s0 = sld [smem:[#allocation26_spill]] }
  0x3a   : > { %s1655_s2 = sld [smem:[#allocation28_spill]]  ;;  %s218_s1 = scalar_lea.sflag [#allocation3], %s217_s4 }
  0x3b   : > { %p904_p3 = pnand %p1653_p10, %p1422_p11  ;;  %s1656_s9 = smov 4  }
  0x3c   : > { %s1657_s14 = smov 64   ;;  %s266_s30 = scalar_lea.vmem [#allocation7], %s1372_s6 }
  0x3d   : > { %s273_s20 = sshll.u32 %s266_s30, 4  ;;  %s1659_s26 = sshll.u32 %s1372_s6, 6  ;;  %s274_s20 = int_to_ptr.vmem [resolvable:$true] %s273_s20 }
  0x3e   : > { %s284_s12 = scalar_lea.vmem [#allocation8], %s1659_s26 }
  0x3f   : > { %s228_s18 = scalar_lea.hbm %s1654_s0, %s788_s5  ;;  %s292_s0 = sshll.u32 %s284_s12, 4  ;;  %s293_s0 = int_to_ptr.vmem [resolvable:$true] %s292_s0 }
  0x40   : > { %s229_s23 = sshll.u32 %s228_s18, 4  ;;  %s269_s25 = scalar_lea.hbm %s1655_s2, %s1266_s27  ;;  %s230_s23 = int_to_ptr.hbm [resolvable:$true] %s229_s23 }
  0x41   : > { %906 = dma.hbm_to_vmem [thread:$0]  (!%p904_p3), %s230_s23, 128, %s232_s29, %s218_s1, %s1657_s14, %s1657_s14, %s1656_s9  }
  0x42   : > { %s271_s8 = sshll.u32 %s269_s25, 4  ;;  %s1658_s18 = sshll.u32 %s1266_s27, 6  ;;  %s272_s8 = int_to_ptr.hbm [resolvable:$true] %s271_s8 }
  0x43   : > { %912 = dma.hbm_to_vmem [thread:$0]  (!%p1385_p5), %s272_s8, 16, %s274_s20, %s1391_s16  }
  0x44   : > { %s289_s24 = scalar_lea.hbm %s1607_s3, %s1658_s18  ;;  %s281_s2 = scalar_lea.sflag [#allocation9], %s1372_s6 }
  0x45   : > { %s290_s4 = sshll.u32 %s289_s24, 4  ;;  %310 = sbr.rel (%p1399_p8) target bundleno = 534 (0x216), region = 40  ;;  %s291_s4 = int_to_ptr.hbm [resolvable:$true] %s290_s4 }
  0x46   : > { %915 = dma.hbm_to_vmem [thread:$0]  (!%p1385_p5), %s291_s4, 1024, %s293_s0, %s281_s2, %s1657_s14, %s1657_s14, %s1656_s9  }
  0x47   : > { %s1507_s20 = sand.u32 (!%p1399_p8), 1, %s1246_s22  }
  0x48   : > { %s796_s23 = sshll.u32 (!%p1399_p8), %s1507_s20, 3  ;;  %s313_s16 = scalar_lea.sflag (!%p1399_p8), [#allocation3], %s1507_s20 }
  0x49   : > { %s1511_s29 = scalar_lea.vmem (!%p1399_p8), [#allocation2], %s796_s23 }
  0x4a   : > { %1213 = dma.done.wait (%p1435_p6), %s313_s16, 128  }
  0x4b   : > { %1215 = vsyncadd (%p1435_p6), %s313_s16, 4294967168  ;;  %s322_s2 = sand.u32 1, %s1404_s11   ;;  %s1519_s6 = sand.u32 1, %s1234_s19  }
  0x4c   : > { %s797_s15 = sshll.u32 %s1519_s6, 6  ;;  %s323_s10 = scalar_lea.sflag [#allocation6], %s322_s2 }
  0x4d   : > { %s326_s25 = scalar_lea.vmem [#allocation5], %s797_s15 }
  0x4e   : > { %1217 = dma.done.wait (%p1442_p0), %s323_s10, 1040  }
  0x4f   : > { %1219 = vsyncadd (%p1442_p0), %s323_s10, 4294966256  ;;  %s335_s17 = scalar_lea.vmem [#allocation7], %s1519_s6  ;;  %s342_s1 = scalar_lea.sflag [#allocation9], %s1519_s6 }
  0x50   : > { %s1528_s9 = scalar_lea.vmem [#allocation8], %s797_s15 }
  0x51   : > { %1221 = dma.done.wait (%p1442_p0), %s342_s1, 1024  }
  0x52   : > { %1223 = vsyncadd (%p1442_p0), %s342_s1, 4294966272  ;;  %v884_v0 = vld [vmem:[%s326_s25 + $0x38] sm:$0xff]  ;;  %v883_v1 = vld [vmem:[%s326_s25 + $0x30] sm:$0xff]  ;;  %s1661_s11 = sld [smem:[#allocation18_spill]]  ;;  %s799_s4 = sshll.u32 %s1507_s20, 4 }
  0x53   : > { %471 = vmatpush.bf16.msra.mxu0 %v884_v0  ;;  %v892_v2 = vld [vmem:[%s1528_s9 + $0x38] sm:$0xff]  ;;  %v891_v3 = vld [vmem:[%s1528_s9 + $0x30] sm:$0xff]  ;;  %v882_v4 = vld [vmem:[%s326_s25 + $0x28] sm:$0xff]  ;;  %s1662_s18 = sld [smem:[#allocation29_spill]]  ;;  %s389_s6 = scalar_lea.vmem [#allocation10], %s799_s4 }
  0x54   : > { %556 = vmatpush.bf16.msra.mxu1 %v892_v2  ;;  %v890_v5 = vld [vmem:[%s1528_s9 + $0x28] sm:$0xff]  ;;  %v881_v6 = vld [vmem:[%s326_s25 + $0x20] sm:$0xff]  ;;  %v880_v8 = vld [vmem:[%s326_s25 + $0x18] sm:$0xff]  ;;  %s1663_s13 = sld [smem:[#allocation17_spill]]  ;;  %s617_s10 = sshll.u32 %s389_s6, 4  ;;  %s618_s10 = int_to_ptr.vmem [resolvable:$true] %s617_s10 }
  0x55   : > { %v889_v7 = vld [vmem:[%s1528_s9 + $0x20] sm:$0xff]  ;;  %v879_v9 = vld [vmem:[%s326_s25 + $0x10] sm:$0xff]  ;;  %v888_v13 = vld [vmem:[%s1528_s9 + $0x18] sm:$0xff]  ;;  %s1664_s0 = sld [smem:[#allocation30_spill]] }
  0x56   : > { %v878_v10 = vld [vmem:[%s326_s25 + $0x8] sm:$0xff]  ;;  %v877_v11 = vld [vmem:[%s326_s25] sm:$0xff]  ;;  %v876_v12 = vld [vmem:[%s1511_s29] sm:$0xff] }
  0x57   : > { %472 = vmatpush.bf16.msra.mxu0 %v883_v1  ;;  %v887_v14 = vld [vmem:[%s1528_s9 + $0x10] sm:$0xff]  ;;  %v886_v15 = vld [vmem:[%s1528_s9 + $0x8] sm:$0xff]  ;;  %v885_v16 = vld [vmem:[%s1528_s9] sm:$0xff] }
  0x58   : > { %557 = vmatpush.bf16.msra.mxu1 %v891_v3  ;;  %p391_p5 = scmp.lt.s32.totalorder %s1661_s11, 1  ;;  %v1014_v18 = vld [vmem:[%s335_s17] ss:$0 sm:$0xff]  ;;  %s870_s26 = sshll.u32 %s1661_s11, 2 }
  0x59   : > { %s603_s17 = scalar_lea.sflag [#allocation4], %s1507_s20 }
  0x5a   : > { %s392_s14 = scalar_select %p391_p5, %s1661_s11, 1 }
  0x5b   : > { %473 = vmatpush.bf16.msra.mxu0 %v882_v4  ;;  %s869_s24 = sshll.u32 %s1663_s13, 1  ;;  %s1160_s8 = scalar_lea.hbm %s1664_s0, 64 }
  0x5c   : > { %558 = vmatpush.bf16.msra.mxu1 %v890_v5  ;;  %s393_s5 = scalar_lea.vmem %s1662_s18, %s392_s14  ;;  %s614_s12 = sadd.s32 %s870_s26, %s869_s24 }
  0x5d   : > { %v1015_v25 = vld [vmem:[%s393_s5] ss:$0 sm:$0xff]  ;;  %s871_s23 = sshll.u32 %s614_s12, 3 }
  0x5e   : > { %s616_s2 = scalar_lea.hbm %s1664_s0, %s871_s23 }
  0x5f   : > { %474 = vmatpush.bf16.msra.mxu0 %v881_v6  ;;  %s619_s25 = sshll.u32 %s616_s2, 4  ;;  %s620_s25 = int_to_ptr.hbm [resolvable:$true] %s619_s25 }
  0x60   : > { %559 = vmatpush.bf16.msra.mxu1 %v889_v7  ;;  %s1154_s1 = sshra.s32 %s620_s25, 4  ;;  %s1155_s1 = int_to_ptr.hbm [resolvable:$true] %s1154_s1 }
  0x61   : > { %s1156_s9 = scalar_lea.hbm %s1155_s1, 16  ;;  %p1161_p1 = scmp.lt.s32.totalorder %s1155_s1, %s1664_s0 }
  0x62   : > { %p1157_p8 = scmp.ne.s32.totalorder %s1155_s1, %s1156_s9  ;;  %p1162_p4 = scmp.lt.s32.totalorder %s1160_s8, %s1156_s9 }
  0x63   : > { %475 = vmatpush.bf16.msra.mxu0 %v880_v8 }
  0x64   : > { %560 = vmatpush.bf16.msra.mxu1 %v888_v13  ;;  %p1158_p11 = pnand %p1157_p8, %p1451_p7  ;;  %p1163_p6 = por %p1162_p4, %p1161_p1 }
  0x66   : > { %p1159_p13 = pneg %p1158_p11 }
  0x67   : > { %476 = vmatpush.bf16.msra.mxu0 %v879_v9 }
  0x68   : > { %561 = vmatpush.bf16.msra.mxu1 %v887_v14  ;;  %p1164_p0 = pnand %p1163_p6, %p1159_p13 }
  0x6b   : > { %477 = vmatpush.bf16.msra.mxu0 %v878_v10 }
  0x6c   : > { %562 = vmatpush.bf16.msra.mxu1 %v886_v15 }
  0x6f   : > { %478 = vmatpush.bf16.msra.mxu0 %v877_v11 }
  0x70   : > { %563 = vmatpush.bf16.msra.mxu1 %v885_v16 }
  0x72   : > { %479 = vmatmul.bf16.vlgmr.msra.gmra.mxu0 %v876_v12 }
  0xef   : > { %v480_v17 = vpop.f32.mrf.mxu0 }
  0xf0   : > { %v481_v19 = vadd.f32 %v1014_v18, %v480_v17 }
  0xf2   : > { %v485_v22 = vmax.f32 %v481_v19, 0.0 }
  0xf7   : > { %v482_v20 = vpop.f32.mrf.mxu0 }
  0xf8   : > { %v483_v21 = vadd.f32 %v1014_v18, %v482_v20 }
  0xfa   : > { %v486_v23 = vmax.f32 %v483_v21, 0.0 }
  0xfc   : > { %v487_v24 = vpack.c.bf16 %v486_v23, %v485_v22 }
  0xfe   : > { %564 = vmatmul.bf16.vlgmr.msra.gmra.mxu1 %v487_v24 }
 0x17b   : > { %v565_v26 = vpop.f32.mrf.mxu1 }
 0x17c   : > { %v566_v27 = vadd.f32 %v1015_v25, %v565_v26 }
 0x17e   : > { %v570_v28 = vmul.f32 %v566_v27, %v566_v27 }
 0x180   : > { %572 = vadd.xlane.f32.xlu0 %v570_v28 }
 0x183   : > { %v567_v29 = vpop.f32.mrf.mxu1 }
 0x184   : > { %v568_v30 = vadd.f32 %v1015_v25, %v567_v29 }
 0x186   : > { %v571_v31 = vmul.f32 %v568_v30, %v568_v30 }
 0x188   : > { %574 = vadd.xlane.f32.xlu0 %v571_v31 }
 0x1f3   : > { %v573_v32 = vpop.xlane.xlu0 %572 }
 0x1f4   : > { %v576_v33 = vadd.f32 1e-14, %v573_v32 }
 0x1f6   : > { %1016 = vrsqrt.f32 %v576_v33  ;;  %vm584_vm1 = vweird.f32 %v576_v33 }
 0x1fb   : > { %v575_v34 = vpop.xlane.xlu0 %574 }
 0x1fc   : > { %v1017_v35 = vpop.eup %1016  ;;  %v577_v36 = vadd.f32 1e-14, %v575_v34 }
 0x1fd   : > { %v579_v37 = vmul.f32 %v1017_v35, %v576_v33  ;;  %vm585_vm0 = vweird.f32 %v1017_v35 }
 0x1fe   : > { %1018 = vrsqrt.f32 %v577_v36  ;;  %vm586_vm2 = vmor %vm584_vm1, %vm585_vm0  ;;  %vm594_vm4 = vweird.f32 %v577_v36 }
 0x1ff   : > { %v580_v38 = vmul.f32 %v1017_v35, %v579_v37 }
 0x201   : > { %v581_v39 = vmul.f32 0.5, %v580_v38 }
 0x203   : > { %v582_v40 = vsub.f32 1.5, %v581_v39 }
 0x204   : > { %v1019_v41 = vpop.eup %1018 }
 0x205   : > { %v583_v42 = vmul.f32 %v1017_v35, %v582_v40  ;;  %v589_v43 = vmul.f32 %v1019_v41, %v577_v36  ;;  %vm595_vm3 = vweird.f32 %v1019_v41 }
 0x206   : > { %vm596_vm5 = vmor %vm594_vm4, %vm595_vm3 }
 0x207   : > { %v587_v44 = vsel %vm586_vm2, %v1017_v35, %v583_v42  ;;  %v590_v45 = vmul.f32 %v1019_v41, %v589_v43 }
 0x208   : > { %v598_v46 = vmul.f32 %v587_v44, %v566_v27 }
 0x209   : > { %v591_v47 = vmul.f32 0.5, %v590_v45 }
 0x20a   : > { %600 = vst [vmem:[%s389_s6] sm:$0xff] %v598_v46 }
 0x20b   : > { %v592_v48 = vsub.f32 1.5, %v591_v47 }
 0x20d   : > { %v593_v49 = vmul.f32 %v1019_v41, %v592_v48 }
 0x20f   : > { %v597_v50 = vsel %vm596_vm5, %v1019_v41, %v593_v49 }
 0x210   : > { %v599_v51 = vmul.f32 %v597_v50, %v568_v30 }
 0x212   : > { %601 = vst [vmem:[%s389_s6 + $0x8] sm:$0xff] %v599_v51 }
 0x213   : > { %1167 = shalt.err (!%p1164_p0)
}
 0x214   : > { %s1274_s20 = smov 128   ;;  %s1275_s5 = smov 8  }
 0x215   : > { %901 = dma.vmem_to_hbm [thread:$0]  (%p1451_p7), %s618_s10, 256, %s620_s25, %s603_s17, %s1274_s20, %s1274_s20, %s1275_s5  }
 0x216 PF: > { %p921_p9 = scmp.ge.s32.totalorder %s1270_s28, 2  ;;  %s634_s13 = sand.u32 1, %s1242_s21  }
 0x217   : > { %s635_s24 = scalar_lea.sflag [#allocation4], %s634_s13 }
 0x218   : > { %p917_p12 = pnand %p921_p9, %p1466_p2 }
 0x21a   : > { %p918_p10 = pneg %p917_p12 }
 0x21c   : > { %1225 = dma.done.wait (%p918_p10), %s635_s24, 256  }
 0x21d   : > { %1227 = vsyncadd (%p918_p10), %s635_s24, 4294967040  ;;  %s27_s28 = sadd.s32 1, %s1270_s28   ;;  %s1666_s26 = sld [smem:[#allocation15_spill]] }
 0x21e   : > { %p24_p3 = scmp.ge.s32.totalorder %s27_s28, 6   ;;  %s1667_s20 = sld [smem:[#allocation24_spill]] }
 0x21f   : > { %s1668_s12 = sld [smem:[#allocation16_spill]]  ;;  %s1673_s18 = smov %s1234_s19 }
 0x220   : > { %s1669_s23 = sld [smem:[#allocation25_spill]]  ;;  %s1675_s21 = smov %s1246_s22 }
 0x221   : > { %s1670_s24 = sld [smem:[#allocation19_spill]]  ;;  %s1677_s25 = smov %s1266_s27 }
 0x222   : > { %s1671_s4 = sld [smem:[#allocation20_spill]] }
 0x223   : > { %s1672_s16 = sld [smem:[#allocation21_spill]]  ;;  %s1674_s19 = smov %s1666_s26 }
 0x225   : > { %s1676_s22 = smov %s1668_s12  ;;  %26 = sbr.rel (!%p24_p3) target bundleno = 19 (0x13), region = 125 }
 0x228   : > { %s1678_s26 = smov %s1671_s4 }
 0x229   : > { %s1679_s27 = smov %s1672_s16 }
 0x22a   :  { %641 = vsyncpa [#allocation3], 1 }
 0x22b   :  { %643 = vsyncpa [#allocation3 + $0x1], 1 }
 0x22c   :  { %644 = vsyncpa [#allocation6], 1 }
 0x22d   :  { %646 = vsyncpa [#allocation6 + $0x1], 1 }
 0x22e   :  { %647 = vsyncpa [#allocation9], 1 }
 0x22f   :  { %649 = vsyncpa [#allocation9 + $0x1], 1 }
 0x230   :  { %650 = vsyncpa [#allocation4], 1 }
 0x231   :  { %652 = vsyncpa [#allocation4 + $0x1], 1 }

</bundles_post_ra>
